<compile_context>
chip_gen: v7x
topology: tpu7x:2x2x1
jax: 0.10.0
libtpu: 0.0.40
codegen_flags: <defaults>
</compile_context>

<pallas_src>
import functools

import jax
import jax.numpy as jnp
from jax.experimental import pallas as pl
from jax.experimental.pallas import tpu as pltpu


def _layernorm2d_kernel(x_ref, w_ref, b_ref, o_ref, *, eps):
    # x_ref/o_ref: (C, tile_hw) block (leading N dim squeezed by the BlockSpec).
    # Every lane column is an independent normalization over the channel
    # (sublane) axis. w_ref/b_ref: (C, 1), constant index_map -> resident.
    x = x_ref[...].astype(jnp.float32)
    mu = jnp.mean(x, axis=0, keepdims=True)            # (1, tile_hw), XLU
    ex2 = jnp.mean(x * x, axis=0, keepdims=True)
    var = jnp.maximum(ex2 - mu * mu, 0.0)              # biased var, one pass
    y = (x - mu) * jax.lax.rsqrt(var + eps)
    w = w_ref[...].astype(jnp.float32)                 # (C, 1) -> lanes
    b = b_ref[...].astype(jnp.float32)
    o_ref[...] = (w * y + b).astype(o_ref.dtype)


def _pick_tile_hw(C, HW, itemsize, target_block_bytes=2 * 1024 * 1024):
    """Lane tile: multiple of 128 (or exactly HW), ~target_block_bytes/block."""
    t = max(1, target_block_bytes // max(1, C * itemsize))
    t = max(128, (t // 128) * 128)
    t = min(t, pl.cdiv(HW, 128) * 128)
    if t >= HW:
        # Single block along HW: block dim == full array dim is always legal,
        # even when HW is not 128-divisible.
        return HW
    return t


def layernorm2d(x, weight, bias, eps=1e-6):
    """x: (N, C, H, W) NCHW, weight/bias: (C,). Returns (N, C, H, W)."""
    N, C, H, W = x.shape
    HW = H * W
    itemsize = jnp.dtype(x.dtype).itemsize

    x3 = x.reshape(N, C, HW)          # free contiguous reshape (no HBM pass)
    w2 = weight.reshape(C, 1)
    b2 = bias.reshape(C, 1)

    tile_hw = _pick_tile_hw(C, HW, itemsize)
    num_tiles = pl.cdiv(HW, tile_hw)

    kernel = functools.partial(_layernorm2d_kernel, eps=eps)

    out3 = pl.pallas_call(
        kernel,
        out_shape=jax.ShapeDtypeStruct((N, C, HW), x.dtype),
        grid_spec=pltpu.PrefetchScalarGridSpec(
            num_scalar_prefetch=0,
            grid=(N, num_tiles),
            in_specs=[
                # Leading N dim is size-1 and squeezed from the kernel view.
                pl.BlockSpec((None, C, tile_hw), lambda n, i: (n, 0, i)),
                pl.BlockSpec((C, 1), lambda n, i: (0, 0)),   # resident weight
                pl.BlockSpec((C, 1), lambda n, i: (0, 0)),   # resident bias
            ],
            out_specs=pl.BlockSpec((None, C, tile_hw), lambda n, i: (n, 0, i)),
        ),
        compiler_params=pltpu.CompilerParams(
            dimension_semantics=("parallel", "parallel"),
            # ~2 MiB blocks x (2-deep in + 2-deep out) ~ 8 MiB << this limit,
            # and also safely inside v7x's 64 MiB physical VMEM.
            vmem_limit_bytes=32 * 1024 * 1024,
        ),
        cost_estimate=pl.CostEstimate(
            flops=7 * N * C * HW,
            transcendentals=N * HW,
            bytes_accessed=2 * N * C * HW * itemsize + 2 * C * itemsize,
        ),
    )(x3, w2, b2)

    return out3.reshape(N, C, H, W)


def layernorm2d_ref(x, weight, bias, eps=1e-6):
    mu = jnp.mean(x, axis=1, keepdims=True)
    var = jnp.mean((x - mu) ** 2, axis=1, keepdims=True)
    xn = (x - mu) / jnp.sqrt(var + eps)
    return weight[None, :, None, None] * xn + bias[None, :, None, None]


if __name__ == "__main__":
    key = jax.random.PRNGKey(0)
    kx, kw, kb = jax.random.split(key, 3)

    N, C, H, W = 2, 4, 16, 16
    x = jax.random.normal(kx, (N, C, H, W), dtype=jnp.float32)
    # Module init is ones/zeros; use deterministic non-trivial values to
    # exercise the affine broadcast.
    weight = 1.0 + 0.1 * jax.random.normal(kw, (C,), dtype=jnp.float32)
    bias = 0.1 * jax.random.normal(kb, (C,), dtype=jnp.float32)

    out = layernorm2d(x, weight, bias)
    out = jax.block_until_ready(out)

    ref = layernorm2d_ref(x, weight, bias)
    assert out.shape == (N, C, H, W)
    assert jnp.allclose(out, ref, atol=1e-5, rtol=1e-5), "mismatch vs reference"

    print("KERNEL_OK")
</pallas_src>

<mosaic_0001>
module attributes {stable_mosaic.version = 11 : i64} {
  func.func @_layernorm2d_kernel(%arg0: i32, %arg1: i32, %arg2: memref<1x4x256xf32, #tpu.memory_space<vmem>>, %arg3: memref<4x1xf32, #tpu.memory_space<vmem>>, %arg4: memref<4x1xf32, #tpu.memory_space<vmem>>, %arg5: memref<1x4x256xf32, #tpu.memory_space<vmem>>) attributes {dimension_semantics = [#tpu.dimension_semantics<parallel>, #tpu.dimension_semantics<parallel>], iteration_bounds = array<i64: 2, 1>, scalar_prefetch = 0 : i64, scratch_operands = 0 : i64, tpu.core_type = #tpu.core_type<tc>, window_params = [{transform_indices = @transform_0, window_bounds = array<i64: 1, 4, 256>}, {pipeline_mode = #tpu.pipeline_mode<synchronous>, transform_indices = @transform_1, window_bounds = array<i64: 4, 1>}, {pipeline_mode = #tpu.pipeline_mode<synchronous>, transform_indices = @transform_2, window_bounds = array<i64: 4, 1>}, {transform_indices = @transform_3, window_bounds = array<i64: 1, 4, 256>}]} {
    %c0 = arith.constant 0 : index
    %c0_0 = arith.constant 0 : index
    %c0_1 = arith.constant 0 : index
    %0 = vector.load %arg2[%c0, %c0_0, %c0_1] : memref<1x4x256xf32, #tpu.memory_space<vmem>>, vector<1x4x256xf32>
    %1 = vector.shape_cast %0 : vector<1x4x256xf32> to vector<4x256xf32>
    %cst = arith.constant dense<0.000000e+00> : vector<256xf32>
    %2 = vector.multi_reduction <add>, %1, %cst [0] : vector<4x256xf32> to vector<256xf32>
    %3 = vector.shape_cast %2 : vector<256xf32> to vector<1x256xf32>
    %cst_2 = arith.constant 4.000000e+00 : f32
    %4 = vector.broadcast %cst_2 : f32 to vector<1x256xf32>
    %5 = arith.divf %3, %4 : vector<1x256xf32>
    %6 = arith.mulf %1, %1 : vector<4x256xf32>
    %cst_3 = arith.constant dense<0.000000e+00> : vector<256xf32>
    %7 = vector.multi_reduction <add>, %6, %cst_3 [0] : vector<4x256xf32> to vector<256xf32>
    %8 = vector.shape_cast %7 : vector<256xf32> to vector<1x256xf32>
    %cst_4 = arith.constant 4.000000e+00 : f32
    %9 = vector.broadcast %cst_4 : f32 to vector<1x256xf32>
    %10 = arith.divf %8, %9 : vector<1x256xf32>
    %11 = arith.mulf %5, %5 : vector<1x256xf32>
    %12 = arith.subf %10, %11 : vector<1x256xf32>
    %cst_5 = arith.constant 0.000000e+00 : f32
    %13 = vector.broadcast %cst_5 : f32 to vector<1x256xf32>
    %14 = arith.maximumf %12, %13 : vector<1x256xf32>
    %15 = vector.broadcast %5 : vector<1x256xf32> to vector<4x256xf32>
    %16 = arith.subf %1, %15 : vector<4x256xf32>
    %cst_6 = arith.constant 9.99999997E-7 : f32
    %17 = vector.broadcast %cst_6 : f32 to vector<1x256xf32>
    %18 = arith.addf %14, %17 : vector<1x256xf32>
    %19 = math.rsqrt %18 : vector<1x256xf32>
    %20 = vector.broadcast %19 : vector<1x256xf32> to vector<4x256xf32>
    %21 = arith.mulf %16, %20 : vector<4x256xf32>
    %c0_7 = arith.constant 0 : index
    %c0_8 = arith.constant 0 : index
    %22 = vector.load %arg3[%c0_7, %c0_8] : memref<4x1xf32, #tpu.memory_space<vmem>>, vector<4x1xf32>
    %c0_9 = arith.constant 0 : index
    %c0_10 = arith.constant 0 : index
    %23 = vector.load %arg4[%c0_9, %c0_10] : memref<4x1xf32, #tpu.memory_space<vmem>>, vector<4x1xf32>
    %24 = vector.broadcast %22 : vector<4x1xf32> to vector<4x256xf32>
    %25 = arith.mulf %24, %21 : vector<4x256xf32>
    %26 = vector.broadcast %23 : vector<4x1xf32> to vector<4x256xf32>
    %27 = arith.addf %25, %26 : vector<4x256xf32>
    %c0_11 = arith.constant 0 : index
    %c0_12 = arith.constant 0 : index
    %c0_13 = arith.constant 0 : index
    %28 = vector.load %arg5[%c0_11, %c0_12, %c0_13] : memref<1x4x256xf32, #tpu.memory_space<vmem>>, vector<1x4x256xf32>
    %29 = vector.shape_cast %28 : vector<1x4x256xf32> to vector<4x256xf32>
    %30 = vector.shape_cast %27 : vector<4x256xf32> to vector<1x4x256xf32>
    tpu.vector_store %arg5[%c0_11, %c0_12, %c0_13], %30 {strides = array<i32>} : memref<1x4x256xf32, #tpu.memory_space<vmem>>, vector<1x4x256xf32>,
    return
  }
  func.func @transform_0(%arg0: i32, %arg1: i32) -> (i32, i32, i32) {
    %c0_i32 = arith.constant 0 : i32
    %c0_i32_0 = arith.constant 0 : i32
    return %arg0, %c0_i32, %arg1 : i32, i32, i32
  }
  func.func @transform_1(%arg0: i32, %arg1: i32) -> (i32, i32) {
    %c0_i32 = arith.constant 0 : i32
    %c0_i32_0 = arith.constant 0 : i32
    %c0_i32_1 = arith.constant 0 : i32
    return %c0_i32, %c0_i32_0 : i32, i32
  }
  func.func @transform_2(%arg0: i32, %arg1: i32) -> (i32, i32) {
    %c0_i32 = arith.constant 0 : i32
    %c0_i32_0 = arith.constant 0 : i32
    %c0_i32_1 = arith.constant 0 : i32
    return %c0_i32, %c0_i32_0 : i32, i32
  }
  func.func @transform_3(%arg0: i32, %arg1: i32) -> (i32, i32, i32) {
    %c0_i32 = arith.constant 0 : i32
    %c0_i32_0 = arith.constant 0 : i32
    return %arg0, %c0_i32, %arg1 : i32, i32, i32
  }
}

</mosaic_0001>

<bundles_post_ra>
// kernel: tpu_custom_call.1
= control target key start
LH: loop header
LB: loop body
LE: loop exit
PB: predicated region body
PF: predicated region fallthrough
CT: control target
= control target key end

     0   :  { %8 = vsyncpa [#allocation3], 0  ;;  %s799_s0 = inlined_call_operand.hbm [shape: f32[2,4,256], index: 0, kind: input, shape index: {}]   ;;  %s800_s1 = inlined_call_operand.vmem [shape: f32[4,1], index: 1, kind: input, shape index: {}]   ;;  %s801_s2 = inlined_call_operand.vmem [shape: f32[4,1], index: 2, kind: input, shape index: {}]   ;;  %s802_s3 = inlined_call_operand.hbm [shape: f32[2,4,256], index: 3, kind: output, shape index: {}]  }
   0x1   :  { %10 = vsyncpa [#allocation3 + $0x1], 0 }
   0x2   :  { %11 = vsyncpa [#allocation4], 0 }
   0x3   :  { %13 = vsyncpa [#allocation4 + $0x1], 0  ;;  %s617_s12 = smov 0   ;;  %s619_s13 = smov 0  }
   0x4   :  { %s621_s14 = smov 0   ;;  %s623_s15 = smov 0  }
   0x5   :  { %s625_s16 = smov 0   ;;  %s627_s17 = smov 0  }
   0x6 LB: > { %s394_s18 = sadd.s32 4294967295, %s592_s17   ;;  %s395_s19 = sadd.s32 4294967294, %s592_s17   ;;  %s592_s17 = sphi %s627_s17, %s19_s17   ;;  %s588_s16 = sphi %s625_s16, %s818_s16   ;;  %s584_s15 = sphi %s623_s15, %s817_s15   ;;  %s580_s14 = sphi %s621_s14, %s816_s14   ;;  %s576_s13 = sphi %s619_s13, %s815_s13   ;;  %s572_s12 = sphi %s617_s12, %s814_s12  }
   0x7   : > { %s31_s20 = sadd.s32 1, %s588_s16  ;;  %s40_s21 = sadd.s32 1, %s580_s14 }
   0x8   : > { %p33_p0 = scmp.ge.s32.totalorder %s31_s20, 2  ;;  %p47_p1 = scmp.ne.s32.totalorder %s580_s14, %s576_s13 }
   0x9   : > { %p48_p2 = scmp.eq.s32.totalorder %s592_s17, 0  ;;  %p53_p3 = scmp.ne.s32.totalorder %s576_s13, %s572_s12 }
   0xa   : > { %s820_s20 = smov (%p33_p0, %s31_s20), 0  ;;  %p54_p5 = scmp.eq.s32.totalorder %s394_s18, 0 }
   0xb   : > { %p658_p4 = por %p48_p2, %p47_p1  ;;  %s35_s23 = ssub.s32 %s588_s16, %s820_s20 }
   0xc   : > { %p121_p6 = scmp.eq.s32.totalorder %s394_s18, 1  ;;  %p38_p7 = scmp.eq.s32.totalorder %s35_s23, 0 }
   0xd   : > { %p664_p8 = por %p54_p5, %p53_p3  ;;  %p127_p10 = scmp.eq.s32.totalorder %s395_s19, 1 }
   0xe   : > { %p668_p9 = por %p121_p6, %p47_p1  ;;  %p423_p13 = scmp.lt.s32.totalorder %s592_s17, 2 }
   0xf   : > { %s673_s26 = scalar_select %p38_p7, %s580_s14, %s40_s21  }
  0x10   : > { %s806_s25 = scalar_select %p668_p9, 1, 0 }
  0x11   : > { %p675_p11 = por %p127_p10, %p53_p3  ;;  %s153_s28 = sand.u32 1, %s580_s14  }
  0x12   : > { %s398_s29 = sshll.u32 %s153_s28, 3  ;;  %s409_s30 = sshll.u32 %s588_s16, 7 }
  0x13   : > { %s807_s27 = scalar_select %p675_p11, 1, 0 }
  0x14   : > { %s686_s6 = scalar_lea.hbm %s799_s0, %s409_s30  ;;  %s157_s7 = scalar_lea.vmem [#allocation2], %s398_s29 }
  0x15   : > { %s167_s8 = sshll.u32 %s157_s7, 4  ;;  %p692_p0 = pnand %p423_p13, %p658_p4  ;;  %s688_s8 = int_to_ptr.vmem [resolvable:$true] %s167_s8 }
  0x16   : > { %s154_s10 = scalar_lea.sflag [#allocation3], %s153_s28  ;;  %s480_s11 = scalar_lea.hbm %s686_s6, 128 }
  0x17   : > { %p481_p3 = scmp.ne.s32.totalorder %s686_s6, %s480_s11  ;;  %p482_p5 = pneg %p692_p0 }
  0x18   : > { %s485_s21 = scalar_lea.hbm %s799_s0, 256  ;;  %p486_p4 = scmp.lt.u32.totalorder %s686_s6, %s799_s0 }
  0x19   : > { %p483_p6 = pnand %p482_p5, %p481_p3  ;;  %p487_p10 = scmp.lt.u32.totalorder %s485_s21, %s480_s11 }
  0x1a   : > { %p489_p12 = scmp.lt.u32.totalorder %s480_s11, %s686_s6 }
  0x1b   : > { %p484_p7 = pneg %p483_p6  ;;  %p488_p13 = por %p487_p10, %p486_p4 }
  0x1d   : > { %p490_p1 = por %p489_p12, %p488_p13 }
  0x1f   : > { %p491_p2 = pnand %p490_p1, %p484_p7 }
  0x21   : > { %494 = shalt.err (!%p491_p2)
}
  0x22   : > { %s495_s28 = scalar_lea.vmem %s688_s8, 128  ;;  %s594_s29 = smov [#allocation2]  }
  0x23   : > { %p496_p3 = scmp.ne.s32.totalorder %s688_s8, %s495_s28  ;;  %s500_s30 = sshll.u32 %s594_s29, 4  ;;  %s501_s30 = int_to_ptr.vmem [resolvable:$false] %s500_s30 }
  0x24   : > { %s502_s4 = scalar_lea.vmem %s501_s30, 256  ;;  %p503_p9 = scmp.lt.s32.totalorder %s688_s8, %s501_s30 }
  0x25   : > { %p498_p6 = pnand %p496_p3, %p482_p5  ;;  %p504_p4 = scmp.lt.s32.totalorder %s502_s4, %s495_s28 }
  0x27   : > { %p499_p11 = pneg %p498_p6  ;;  %p505_p10 = por %p504_p4, %p503_p9 }
  0x29   : > { %p506_p12 = pnand %p505_p10, %p499_p11 }
  0x2b   : > { %509 = shalt.err (!%p506_p12)
}
  0x2c   : > { %418 = dma.hbm_to_vmem [thread:$0]  (!%p692_p0), %s686_s6, 128, %s688_s8, %s154_s10  }
  0x2d   : > { %p809_p1 = scmp.lt.s32.totalorder %s592_s17, 3  ;;  %p810_p2 = scmp.ge.s32.totalorder %s592_s17, 1 }
  0x2f   : > { %p173_p5 = pnand %p810_p2, %p809_p1 }
  0x30   : > { %s728_s5 = sand.u32 (!%p173_p5), 1, %s576_s13  }
  0x31   : > { %176 = sbr.rel (%p173_p5) target bundleno = 209 (0xd1), region = 32  ;;  %s402_s7 = sshll.u32 (!%p173_p5), %s728_s5, 3 }
  0x32   : > { %s179_s11 = scalar_lea.sflag (!%p173_p5), [#allocation3], %s728_s5  ;;  %s182_s9 = scalar_lea.vmem (!%p173_p5), [#allocation2], %s402_s7 }
  0x38   : > { %563 = dma.done.wait (%p664_p8), %s179_s11, 128  }
  0x39   : > { %565 = vsyncadd (%p664_p8), %s179_s11, 4294967168  ;;  %v595_v0 = vmov 0   ;;  %v269_v1 = vld [vmem:[%s800_s1] sm:$0xf]  ;;  %vm211_vm0 = vcmask 1043456   ;;  %s410_s24 = sshll.u32 %s584_s15, 7 }
  0x3a   : > { %474 = vset.pattern.permute.xlu0 %v595_v0  ;;  %v270_v2 = vld [vmem:[%s801_s2] sm:$0xf]  ;;  %s204_s19 = scalar_lea.vmem [#allocation5], %s402_s7  ;;  %s750_s28 = scalar_lea.hbm %s802_s3, %s410_s24 }
  0x3b   : > { %273 = vperm.xlu0 %474, %v269_v1   ;;  %v207_v3 = vld [vmem:[%s182_s9] sm:$0xff]  ;;  %s310_s21 = sshll.u32 %s204_s19, 4  ;;  %s294_s29 = scalar_lea.sflag [#allocation4], %s728_s5  ;;  %s752_s21 = int_to_ptr.vmem [resolvable:$true] %s310_s21 }
  0x3c   : > { %v209_v4 = vcombine.high %v207_v3, %v207_v3  ;;  %v229_v5 = vmul.f32 %v207_v3, %v207_v3  ;;  %v212_v6 = vsel %vm211_vm0, %v207_v3, 0.0  ;;  %s510_s30 = scalar_lea.vmem %s752_s21, 128  ;;  %p811_p9 = scmp.ne.s32.totalorder %s806_s25, 0 }
  0x3d   : > { %v213_v9 = vrot.slane %v212_v6, 4  ;;  %p511_p8 = scmp.ne.s32.totalorder %s752_s21, %s510_s30  ;;  %s596_s15 = smov [#allocation5]  }
  0x3e   : > { %v219_v7 = vsel %vm211_vm0, %v209_v4, 0.0  ;;  %v231_v8 = vcombine.high %v229_v5, %v229_v5  ;;  %v233_v11 = vsel %vm211_vm0, %v229_v5, 0.0  ;;  %s514_s4 = sshll.u32 %s596_s15, 4  ;;  %s515_s4 = int_to_ptr.vmem [resolvable:$false] %s514_s4 }
  0x3f   : > { %283 = vperm.xlu0 %474, %v270_v2   ;;  %v220_v10 = vrot.slane %v219_v7, 4  ;;  %v214_v13 = vadd.f32 %v213_v9, %v212_v6  ;;  %v234_v14 = vrot.slane %v233_v11, 4  ;;  %p512_p11 = pnand %p511_p8, %p811_p9  ;;  %s516_s7 = scalar_lea.vmem %s515_s4, 256 }
  0x40   : > { %v240_v12 = vsel %vm211_vm0, %v231_v8, 0.0  ;;  %p517_p7 = scmp.lt.s32.totalorder %s752_s21, %s515_s4  ;;  %p518_p13 = scmp.lt.s32.totalorder %s516_s7, %s510_s30 }
  0x41   : > { %v221_v15 = vadd.f32 %v220_v10, %v219_v7  ;;  %v241_v16 = vrot.slane %v240_v12, 4  ;;  %v215_v17 = vrot.slane %v214_v13, 2  ;;  %v235_v18 = vadd.f32 %v234_v14, %v233_v11  ;;  %p513_p0 = pneg %p512_p11 }
  0x42   : > { %p519_p3 = por %p518_p13, %p517_p7 }
  0x43   : > { %v222_v19 = vrot.slane %v221_v15, 2  ;;  %v242_v20 = vadd.f32 %v241_v16, %v240_v12  ;;  %v216_v21 = vadd.f32 %v215_v17, %v214_v13  ;;  %v236_v22 = vrot.slane %v235_v18, 2 }
  0x44   : > { %p520_p6 = pnand %p519_p3, %p513_p0 }
  0x45   : > { %v223_v23 = vadd.f32 %v222_v19, %v221_v15  ;;  %v243_v24 = vrot.slane %v242_v20, 2  ;;  %v217_v25 = vrot.slane %v216_v21, 1  ;;  %v237_v26 = vadd.f32 %v236_v22, %v235_v18 }
  0x47   : > { %v224_v27 = vrot.slane %v223_v23, 1  ;;  %v244_v28 = vadd.f32 %v243_v24, %v242_v20  ;;  %v218_v29 = vadd.f32 %v217_v25, %v216_v21  ;;  %v238_v30 = vrot.slane %v237_v26, 1 }
  0x49   : > { %v225_v31 = vadd.f32 %v224_v27, %v223_v23  ;;  %v245_v32 = vrot.slane %v244_v28, 1  ;;  %v227_v33 = vmul.f32 0.25, %v218_v29  ;;  %v239_v34 = vadd.f32 %v238_v30, %v237_v26 }
  0x4b   : > { %v228_v35 = vmul.f32 0.25, %v225_v31  ;;  %v246_v36 = vadd.f32 %v245_v32, %v244_v28  ;;  %v247_v37 = vmul.f32 0.25, %v239_v34  ;;  %v249_v38 = vmul.f32 %v227_v33, %v227_v33 }
  0x4d   : > { %v248_v39 = vmul.f32 0.25, %v246_v36  ;;  %v250_v40 = vmul.f32 %v228_v35, %v228_v35  ;;  %v251_v41 = vsub.f32 %v247_v37, %v249_v38  ;;  %v257_v48 = vcombine.low %v227_v33, %v228_v35 }
  0x4f   : > { %v252_v42 = vsub.f32 %v248_v39, %v250_v40  ;;  %v253_v43 = vmax.f32 %v251_v41, 0.0  ;;  %v259_v50 = vsub.f32 %v207_v3, %v257_v48 }
  0x51   : > { %v254_v44 = vmax.f32 %v252_v42, 0.0  ;;  %v260_v45 = vadd.f32 1e-06, %v253_v43 }
  0x53   : > { %v261_v46 = vadd.f32 1e-06, %v254_v44  ;;  %476 = vrsqrt.f32 %v260_v45 }
  0x55   : > { %478 = vrsqrt.f32 %v261_v46 }
  0x5d   : > { %v477_v47 = vpop.eup %476 }
  0x5f   : > { %v479_v49 = vpop.eup %478 }
  0x60   : > { %v266_v51 = vcombine.low %v477_v47, %v479_v49 }
  0x62   : > { %v268_v52 = vmul.f32 %v266_v51, %v259_v50 }
  0x64   : > { %v277_v53 = vcombine.high %v268_v52, %v268_v52 }
  0xba   : > { %v274_v54 = vpop.permute.xlu0 %273 }
  0xbb   : > { %v279_v55 = vmul.f32 %v274_v54, %v268_v52  ;;  %v280_v56 = vmul.f32 %v277_v53, %v274_v54 }
  0xbe   : > { %v284_v57 = vpop.permute.xlu0 %283 }
  0xbf   : > { %v286_v58 = vadd.f32 %v284_v57, %v279_v55  ;;  %v287_v59 = vadd.f32 %v284_v57, %v280_v56 }
  0xc1   : > { %v290_v60 = vcombine.low %v286_v58, %v287_v59 }
  0xc3   : > { %292 = vst [vmem:[%s204_s19] sm:$0xff] %v290_v60 }
  0xc4   : > { %523 = shalt.err (!%p520_p6)
}
  0xc5   : > { %s524_s5 = scalar_lea.hbm %s750_s28, 128  ;;  %s528_s6 = scalar_lea.hbm %s802_s3, 256 }
  0xc6   : > { %p525_p4 = scmp.ne.s32.totalorder %s750_s28, %s524_s5  ;;  %p529_p1 = scmp.lt.u32.totalorder %s750_s28, %s802_s3 }
  0xc7   : > { %p530_p2 = scmp.lt.u32.totalorder %s528_s6, %s524_s5  ;;  %p532_p8 = scmp.lt.u32.totalorder %s524_s5, %s750_s28 }
  0xc8   : > { %p526_p10 = pnand %p525_p4, %p811_p9 }
  0xc9   : > { %p531_p5 = por %p530_p2, %p529_p1 }
  0xca   : > { %p527_p12 = pneg %p526_p10 }
  0xcb   : > { %p533_p11 = por %p532_p8, %p531_p5 }
  0xcd   : > { %p534_p0 = pnand %p533_p11, %p527_p12 }
  0xcf   : > { %537 = shalt.err (!%p534_p0)
}
  0xd0   : > { %413 = dma.vmem_to_hbm [thread:$0]  (%p811_p9), %s752_s21, 128, %s750_s28, %s294_s29  }
  0xd1 PF: > { %s322_s18 = sand.u32 1, %s572_s12   ;;  %p812_p7 = scmp.ne.s32.totalorder %s807_s27, 0 }
  0xd2   : > { %p813_p13 = scmp.ge.s32.totalorder %s592_s17, 2  ;;  %s323_s24 = scalar_lea.sflag [#allocation4], %s322_s18 }
  0xd4   : > { %p420_p3 = pnand %p813_p13, %p812_p7 }
  0xd6   : > { %567 = dma.done.wait (!%p420_p3), %s323_s24, 128  }
  0xd7   : > { %569 = vsyncadd (!%p420_p3), %s323_s24, 4294967168  ;;  %s19_s17 = sadd.s32 1, %s592_s17   ;;  %s814_s12 = smov %s576_s13 }
  0xd8   : > { %p16_p6 = scmp.ge.s32.totalorder %s19_s17, 4   ;;  %s815_s13 = smov %s580_s14 }
  0xd9   : > { %s816_s14 = smov %s673_s26  ;;  %s817_s15 = smov %s588_s16 }
  0xda   : > { %s818_s16 = smov %s820_s20  ;;  %18 = sbr.rel (!%p16_p6) target bundleno = 6 (0x6), region = 77 }
  0xe1   :  { %328 = vsyncpa [#allocation3], 1 }
  0xe2   :  { %330 = vsyncpa [#allocation3 + $0x1], 1 }
  0xe3   :  { %331 = vsyncpa [#allocation4], 1 }
  0xe4   :  { %333 = vsyncpa [#allocation4 + $0x1], 1 }

</bundles_post_ra>
